<compile_context>
chip_gen: v7x
topology: tpu7x:2x2x1
jax: 0.10.0
libtpu: 0.0.40
codegen_flags: <defaults>
</compile_context>

<pallas_src>
import jax
import jax.numpy as jnp
from jax.experimental import pallas as pl
from jax.experimental.pallas import tpu as pltpu


_LANES = 128  # lane-dense width used for all hidden activations and the output slab


def _round_up(x, m):
    return ((x + m - 1) // m) * m


def modelf_kernel(x_ref, w0_ref, wh_ref, b_ref, out_ref):
    """(TILE_B, image_size) f32 batch tile -> (TILE_B, 128) bf16 log_softmax tile."""
    # f32 -> bf16 cast happens here (VPU), not as a separate wrapper pass.
    h = x_ref[...].astype(jnp.bfloat16)

    def sigmoid_f32(z):
        # Single EUP push (tanh) instead of exp + reciprocal (2 pushes).
        return 0.5 * jnp.tanh(0.5 * z) + 0.5

    # fc0: (tb, image_size) @ (image_size, 128) -> f32 accumulate on MXU
    z = jnp.dot(h, w0_ref[...], preferred_element_type=jnp.float32) + b_ref[0]
    h = sigmoid_f32(z).astype(jnp.bfloat16)

    # fc1..fc4: all padded to 128x128 (zero pad rows/cols => exact), lane-dense
    for i in range(4):
        z = jnp.dot(h, wh_ref[i], preferred_element_type=jnp.float32) + b_ref[i + 1]
        h = sigmoid_f32(z).astype(jnp.bfloat16)

    # fc5 head (cols padded to 128, padded bias = -1e30 so softmax ignores them) + log_softmax
    z = jnp.dot(h, wh_ref[4], preferred_element_type=jnp.float32) + b_ref[5]
    m = jnp.max(z, axis=1, keepdims=True)
    s = z - m
    lse = jnp.log(jnp.sum(jnp.exp(s), axis=1, keepdims=True))
    out_ref[...] = (s - lse).astype(out_ref.dtype)


def _pick_tile(batch, image_size, max_tile=8192, vmem_budget_bytes=24 << 20):
    """Generation-aware batch tile: big enough to amortize ~0.35us/step overhead,
    small enough for VMEM (v5e/v7x), and >=2 grid steps for v7x's two TensorCores."""
    # Streamed VMEM per batch row: f32 x block (double-buffered) + bf16 out block
    # (double-buffered) + ~2 live f32 (row,128) intermediates of headroom.
    per_row = 8 * image_size + 2 * 2 * _LANES + 2 * 4 * _LANES
    cap = min(max_tile, vmem_budget_bytes // per_row)
    cap = max(16, (cap // 16) * 16)              # bf16 sublane packing -> multiple of 16
    b16 = _round_up(batch, 16)
    if b16 < 32:
        return 16
    steps = max(2, -(-b16 // cap))               # >=2 steps so the 2nd TC (v7x) has work
    tb = _round_up(-(-b16 // steps), 16)         # bounds padding waste to <~16 rows typ.
    return max(16, min(tb, cap))


def modelf_forward(x, params, *, max_tile=8192):
    """x: anything reshapable to (-1, image_size); params: [(W,b)]x6 with W shaped (in,out)."""
    image_size = params[0][0].shape[0]
    n_outputs = params[-1][0].shape[1]
    assert n_outputs <= _LANES

    xf = jnp.reshape(x, (-1, image_size)).astype(jnp.float32)  # torch's x.view(-1, image_size)
    batch = xf.shape[0]

    tb = _pick_tile(batch, image_size, max_tile)
    b_pad = _round_up(batch, tb)
    if b_pad != batch:
        xf = jnp.pad(xf, ((0, b_pad - batch), (0, 0)))

    # ---- pack parameters: w0 (image_size,128) bf16; wh (5,128,128) bf16; biases (6,1,128) f32
    dims = [w.shape[1] for (w, _) in params]       # [128, 64, 10, 10, 10, n_outputs]
    w0 = params[0][0].astype(jnp.bfloat16)         # fc0 is already 128-lane dense

    wh_list = []
    for i in range(1, 6):
        w = params[i][0].astype(jnp.float32)
        fi, fo = w.shape
        # zero-padded rows/cols keep the math exact (padded activations hit zero weights)
        w = jnp.pad(w, ((0, _LANES - fi), (0, _LANES - fo)))
        wh_list.append(w.astype(jnp.bfloat16))
    wh = jnp.stack(wh_list, axis=0)                # (5, 128, 128)

    b_list = []
    for i, (_, b) in enumerate(params):
        b = b.reshape(1, -1).astype(jnp.float32)
        padv = -1e30 if i == 5 else 0.0            # head pad -> effectively -inf for softmax
        b = jnp.pad(b, ((0, 0), (0, _LANES - b.shape[1])), constant_values=padv)
        b_list.append(b)
    bslab = jnp.stack(b_list, axis=0)              # (6, 1, 128)

    grid = (b_pad // tb,)

    flops = 2 * batch * sum(a * b for a, b in zip([image_size] + dims[:-1], dims))
    cost = pl.CostEstimate(
        flops=flops,
        transcendentals=batch * (sum(dims[:-1]) + _LANES),
        bytes_accessed=b_pad * (4 * image_size + 2 * _LANES)
        + 2 * w0.size + 2 * wh.size + 4 * bslab.size,
    )

    out_padded = pl.pallas_call(
        modelf_kernel,
        grid=grid,
        in_specs=[
            pl.BlockSpec((tb, image_size), lambda i: (i, 0)),   # streamed batch tile (f32)
            pl.BlockSpec(w0.shape, lambda i: (0, 0)),           # VMEM-resident
            pl.BlockSpec(wh.shape, lambda i: (0, 0, 0)),        # VMEM-resident
            pl.BlockSpec(bslab.shape, lambda i: (0, 0, 0)),     # VMEM-resident
        ],
        out_specs=pl.BlockSpec((tb, _LANES), lambda i: (i, 0)),
        out_shape=jax.ShapeDtypeStruct((b_pad, _LANES), jnp.bfloat16),
        compiler_params=pltpu.CompilerParams(
            dimension_semantics=("parallel",),
            vmem_limit_bytes=48 << 20,   # explicit: v5e default scoped VMEM is only 16 MiB
        ),
        cost_estimate=cost,
    )(xf, w0, wh, bslab)

    return out_padded[:batch, :n_outputs].astype(jnp.float32)


def init_linear(key, fan_in, fan_out):
    """Deterministic init mimicking torch.nn.Linear default (uniform +/- 1/sqrt(fan_in))."""
    kw, kb = jax.random.split(key)
    bound = 1.0 / jnp.sqrt(fan_in)
    w = jax.random.uniform(kw, (fan_in, fan_out), jnp.float32, -bound, bound)
    b = jax.random.uniform(kb, (fan_out,), jnp.float32, -bound, bound)
    return w, b


def _reference_forward(x, params):
    """Pure-JAX reference with matching bf16 matmul inputs (exact sigmoid / log_softmax)."""
    image_size = params[0][0].shape[0]
    h = jnp.reshape(x, (-1, image_size)).astype(jnp.bfloat16)
    for i, (w, b) in enumerate(params):
        z = jnp.dot(h, w.astype(jnp.bfloat16),
                    preferred_element_type=jnp.float32) + b.astype(jnp.float32)
        if i < len(params) - 1:
            h = jax.nn.sigmoid(z).astype(jnp.bfloat16)
        else:
            return jax.nn.log_softmax(z, axis=1)


if __name__ == "__main__":
    image_size = 64     # e.g. 1x8x8 "images"
    n_outputs = 10
    batch = 8

    root = jax.random.PRNGKey(0)
    keys = jax.random.split(root, 7)

    layer_dims = [(image_size, 128), (128, 64), (64, 10), (10, 10), (10, 10), (10, n_outputs)]
    params = [init_linear(k, fi, fo) for k, (fi, fo) in zip(keys[:6], layer_dims)]

    x = jax.random.normal(keys[6], (batch, 1, 8, 8), dtype=jnp.float32)

    out = modelf_forward(x, params)
    out = jax.block_until_ready(out)

    assert out.shape == (batch, n_outputs)
    assert bool(jnp.all(jnp.isfinite(out)))

    # log_softmax rows must sum (in prob space) to ~1 (bf16 output slab -> ~0.2% tolerance)
    row_sums = jnp.sum(jnp.exp(out), axis=1)
    assert bool(jnp.all(jnp.abs(row_sums - 1.0) < 2e-2))

    # parity with a pure-JAX reference (bf16 output store + hw tanh are the only deltas)
    ref = _reference_forward(x, params)
    assert bool(jnp.max(jnp.abs(out - ref)) < 0.1)

    print("KERNEL_OK")
</pallas_src>

<mosaic_0001>
module attributes {stable_mosaic.version = 11 : i64} {
  func.func @modelf_kernel(%arg0: i32, %arg1: memref<16x64xf32, #tpu.memory_space<vmem>>, %arg2: memref<64x128xbf16, #tpu.memory_space<vmem>>, %arg3: memref<5x128x128xbf16, #tpu.memory_space<vmem>>, %arg4: memref<6x1x128xf32, #tpu.memory_space<vmem>>, %arg5: memref<16x128xbf16, #tpu.memory_space<vmem>>) attributes {dimension_semantics = [#tpu.dimension_semantics<parallel>], iteration_bounds = array<i64: 1>, scalar_prefetch = 0 : i64, scratch_operands = 0 : i64, tpu.core_type = #tpu.core_type<tc>, window_params = [{transform_indices = @transform_0, window_bounds = array<i64: 16, 64>}, {pipeline_mode = #tpu.pipeline_mode<synchronous>, transform_indices = @transform_1, window_bounds = array<i64: 64, 128>}, {pipeline_mode = #tpu.pipeline_mode<synchronous>, transform_indices = @transform_2, window_bounds = array<i64: 5, 128, 128>}, {pipeline_mode = #tpu.pipeline_mode<synchronous>, transform_indices = @transform_3, window_bounds = array<i64: 6, 1, 128>}, {transform_indices = @transform_4, window_bounds = array<i64: 16, 128>}]} {
    %c0 = arith.constant 0 : index
    %c0_0 = arith.constant 0 : index
    %0 = vector.load %arg1[%c0, %c0_0] : memref<16x64xf32, #tpu.memory_space<vmem>>, vector<16x64xf32>
    %1 = arith.truncf %0 : vector<16x64xf32> to vector<16x64xbf16>
    %c0_1 = arith.constant 0 : index
    %c0_2 = arith.constant 0 : index
    %2 = vector.load %arg2[%c0_1, %c0_2] : memref<64x128xbf16, #tpu.memory_space<vmem>>, vector<64x128xbf16>
    %cst = arith.constant dense<0.000000e+00> : vector<16x128xf32>
    %3 = tpu.matmul %1, %2, %cst {dimension_numbers = #tpu.dot_dimension_numbers<[1], [0], [0], [1], [0, 0, 1, 1], [], []>} : vector<16x64xbf16>, vector<64x128xbf16>, vector<16x128xf32> -> vector<16x128xf32>
    %c0_3 = arith.constant 0 : index
    %c0_4 = arith.constant 0 : index
    %c0_5 = arith.constant 0 : index
    %4 = vector.load %arg4[%c0_3, %c0_4, %c0_5] : memref<6x1x128xf32, #tpu.memory_space<vmem>>, vector<1x1x128xf32>
    %5 = vector.shape_cast %4 : vector<1x1x128xf32> to vector<1x128xf32>
    %6 = vector.broadcast %5 : vector<1x128xf32> to vector<16x128xf32>
    %7 = arith.addf %3, %6 : vector<16x128xf32>
    %cst_6 = arith.constant 5.000000e-01 : f32
    %8 = vector.broadcast %cst_6 : f32 to vector<16x128xf32>
    %9 = arith.mulf %8, %7 : vector<16x128xf32>
    %10 = math.tanh %9 : vector<16x128xf32>
    %cst_7 = arith.constant 5.000000e-01 : f32
    %11 = vector.broadcast %cst_7 : f32 to vector<16x128xf32>
    %12 = arith.mulf %11, %10 : vector<16x128xf32>
    %cst_8 = arith.constant 5.000000e-01 : f32
    %13 = vector.broadcast %cst_8 : f32 to vector<16x128xf32>
    %14 = arith.addf %12, %13 : vector<16x128xf32>
    %15 = arith.truncf %14 : vector<16x128xf32> to vector<16x128xbf16>
    %c0_9 = arith.constant 0 : index
    %c0_10 = arith.constant 0 : index
    %c0_11 = arith.constant 0 : index
    %16 = vector.load %arg3[%c0_9, %c0_10, %c0_11] : memref<5x128x128xbf16, #tpu.memory_space<vmem>>, vector<1x128x128xbf16>
    %17 = vector.shape_cast %16 : vector<1x128x128xbf16> to vector<128x128xbf16>
    %cst_12 = arith.constant dense<0.000000e+00> : vector<16x128xf32>
    %18 = tpu.matmul %15, %17, %cst_12 {dimension_numbers = #tpu.dot_dimension_numbers<[1], [0], [0], [1], [0, 0, 1, 1], [], []>} : vector<16x128xbf16>, vector<128x128xbf16>, vector<16x128xf32> -> vector<16x128xf32>
    %c1 = arith.constant 1 : index
    %c0_13 = arith.constant 0 : index
    %c0_14 = arith.constant 0 : index
    %19 = vector.load %arg4[%c1, %c0_13, %c0_14] : memref<6x1x128xf32, #tpu.memory_space<vmem>>, vector<1x1x128xf32>
    %20 = vector.shape_cast %19 : vector<1x1x128xf32> to vector<1x128xf32>
    %21 = vector.broadcast %20 : vector<1x128xf32> to vector<16x128xf32>
    %22 = arith.addf %18, %21 : vector<16x128xf32>
    %cst_15 = arith.constant 5.000000e-01 : f32
    %23 = vector.broadcast %cst_15 : f32 to vector<16x128xf32>
    %24 = arith.mulf %23, %22 : vector<16x128xf32>
    %25 = math.tanh %24 : vector<16x128xf32>
    %cst_16 = arith.constant 5.000000e-01 : f32
    %26 = vector.broadcast %cst_16 : f32 to vector<16x128xf32>
    %27 = arith.mulf %26, %25 : vector<16x128xf32>
    %cst_17 = arith.constant 5.000000e-01 : f32
    %28 = vector.broadcast %cst_17 : f32 to vector<16x128xf32>
    %29 = arith.addf %27, %28 : vector<16x128xf32>
    %30 = arith.truncf %29 : vector<16x128xf32> to vector<16x128xbf16>
    %c1_18 = arith.constant 1 : index
    %c0_19 = arith.constant 0 : index
    %c0_20 = arith.constant 0 : index
    %31 = vector.load %arg3[%c1_18, %c0_19, %c0_20] : memref<5x128x128xbf16, #tpu.memory_space<vmem>>, vector<1x128x128xbf16>
    %32 = vector.shape_cast %31 : vector<1x128x128xbf16> to vector<128x128xbf16>
    %cst_21 = arith.constant dense<0.000000e+00> : vector<16x128xf32>
    %33 = tpu.matmul %30, %32, %cst_21 {dimension_numbers = #tpu.dot_dimension_numbers<[1], [0], [0], [1], [0, 0, 1, 1], [], []>} : vector<16x128xbf16>, vector<128x128xbf16>, vector<16x128xf32> -> vector<16x128xf32>
    %c2 = arith.constant 2 : index
    %c0_22 = arith.constant 0 : index
    %c0_23 = arith.constant 0 : index
    %34 = vector.load %arg4[%c2, %c0_22, %c0_23] : memref<6x1x128xf32, #tpu.memory_space<vmem>>, vector<1x1x128xf32>
    %35 = vector.shape_cast %34 : vector<1x1x128xf32> to vector<1x128xf32>
    %36 = vector.broadcast %35 : vector<1x128xf32> to vector<16x128xf32>
    %37 = arith.addf %33, %36 : vector<16x128xf32>
    %cst_24 = arith.constant 5.000000e-01 : f32
    %38 = vector.broadcast %cst_24 : f32 to vector<16x128xf32>
    %39 = arith.mulf %38, %37 : vector<16x128xf32>
    %40 = math.tanh %39 : vector<16x128xf32>
    %cst_25 = arith.constant 5.000000e-01 : f32
    %41 = vector.broadcast %cst_25 : f32 to vector<16x128xf32>
    %42 = arith.mulf %41, %40 : vector<16x128xf32>
    %cst_26 = arith.constant 5.000000e-01 : f32
    %43 = vector.broadcast %cst_26 : f32 to vector<16x128xf32>
    %44 = arith.addf %42, %43 : vector<16x128xf32>
    %45 = arith.truncf %44 : vector<16x128xf32> to vector<16x128xbf16>
    %c2_27 = arith.constant 2 : index
    %c0_28 = arith.constant 0 : index
    %c0_29 = arith.constant 0 : index
    %46 = vector.load %arg3[%c2_27, %c0_28, %c0_29] : memref<5x128x128xbf16, #tpu.memory_space<vmem>>, vector<1x128x128xbf16>
    %47 = vector.shape_cast %46 : vector<1x128x128xbf16> to vector<128x128xbf16>
    %cst_30 = arith.constant dense<0.000000e+00> : vector<16x128xf32>
    %48 = tpu.matmul %45, %47, %cst_30 {dimension_numbers = #tpu.dot_dimension_numbers<[1], [0], [0], [1], [0, 0, 1, 1], [], []>} : vector<16x128xbf16>, vector<128x128xbf16>, vector<16x128xf32> -> vector<16x128xf32>
    %c3 = arith.constant 3 : index
    %c0_31 = arith.constant 0 : index
    %c0_32 = arith.constant 0 : index
    %49 = vector.load %arg4[%c3, %c0_31, %c0_32] : memref<6x1x128xf32, #tpu.memory_space<vmem>>, vector<1x1x128xf32>
    %50 = vector.shape_cast %49 : vector<1x1x128xf32> to vector<1x128xf32>
    %51 = vector.broadcast %50 : vector<1x128xf32> to vector<16x128xf32>
    %52 = arith.addf %48, %51 : vector<16x128xf32>
    %cst_33 = arith.constant 5.000000e-01 : f32
    %53 = vector.broadcast %cst_33 : f32 to vector<16x128xf32>
    %54 = arith.mulf %53, %52 : vector<16x128xf32>
    %55 = math.tanh %54 : vector<16x128xf32>
    %cst_34 = arith.constant 5.000000e-01 : f32
    %56 = vector.broadcast %cst_34 : f32 to vector<16x128xf32>
    %57 = arith.mulf %56, %55 : vector<16x128xf32>
    %cst_35 = arith.constant 5.000000e-01 : f32
    %58 = vector.broadcast %cst_35 : f32 to vector<16x128xf32>
    %59 = arith.addf %57, %58 : vector<16x128xf32>
    %60 = arith.truncf %59 : vector<16x128xf32> to vector<16x128xbf16>
    %c3_36 = arith.constant 3 : index
    %c0_37 = arith.constant 0 : index
    %c0_38 = arith.constant 0 : index
    %61 = vector.load %arg3[%c3_36, %c0_37, %c0_38] : memref<5x128x128xbf16, #tpu.memory_space<vmem>>, vector<1x128x128xbf16>
    %62 = vector.shape_cast %61 : vector<1x128x128xbf16> to vector<128x128xbf16>
    %cst_39 = arith.constant dense<0.000000e+00> : vector<16x128xf32>
    %63 = tpu.matmul %60, %62, %cst_39 {dimension_numbers = #tpu.dot_dimension_numbers<[1], [0], [0], [1], [0, 0, 1, 1], [], []>} : vector<16x128xbf16>, vector<128x128xbf16>, vector<16x128xf32> -> vector<16x128xf32>
    %c4 = arith.constant 4 : index
    %c0_40 = arith.constant 0 : index
    %c0_41 = arith.constant 0 : index
    %64 = vector.load %arg4[%c4, %c0_40, %c0_41] : memref<6x1x128xf32, #tpu.memory_space<vmem>>, vector<1x1x128xf32>
    %65 = vector.shape_cast %64 : vector<1x1x128xf32> to vector<1x128xf32>
    %66 = vector.broadcast %65 : vector<1x128xf32> to vector<16x128xf32>
    %67 = arith.addf %63, %66 : vector<16x128xf32>
    %cst_42 = arith.constant 5.000000e-01 : f32
    %68 = vector.broadcast %cst_42 : f32 to vector<16x128xf32>
    %69 = arith.mulf %68, %67 : vector<16x128xf32>
    %70 = math.tanh %69 : vector<16x128xf32>
    %cst_43 = arith.constant 5.000000e-01 : f32
    %71 = vector.broadcast %cst_43 : f32 to vector<16x128xf32>
    %72 = arith.mulf %71, %70 : vector<16x128xf32>
    %cst_44 = arith.constant 5.000000e-01 : f32
    %73 = vector.broadcast %cst_44 : f32 to vector<16x128xf32>
    %74 = arith.addf %72, %73 : vector<16x128xf32>
    %75 = arith.truncf %74 : vector<16x128xf32> to vector<16x128xbf16>
    %c4_45 = arith.constant 4 : index
    %c0_46 = arith.constant 0 : index
    %c0_47 = arith.constant 0 : index
    %76 = vector.load %arg3[%c4_45, %c0_46, %c0_47] : memref<5x128x128xbf16, #tpu.memory_space<vmem>>, vector<1x128x128xbf16>
    %77 = vector.shape_cast %76 : vector<1x128x128xbf16> to vector<128x128xbf16>
    %cst_48 = arith.constant dense<0.000000e+00> : vector<16x128xf32>
    %78 = tpu.matmul %75, %77, %cst_48 {dimension_numbers = #tpu.dot_dimension_numbers<[1], [0], [0], [1], [0, 0, 1, 1], [], []>} : vector<16x128xbf16>, vector<128x128xbf16>, vector<16x128xf32> -> vector<16x128xf32>
    %c5 = arith.constant 5 : index
    %c0_49 = arith.constant 0 : index
    %c0_50 = arith.constant 0 : index
    %79 = vector.load %arg4[%c5, %c0_49, %c0_50] : memref<6x1x128xf32, #tpu.memory_space<vmem>>, vector<1x1x128xf32>
    %80 = vector.shape_cast %79 : vector<1x1x128xf32> to vector<1x128xf32>
    %81 = vector.broadcast %80 : vector<1x128xf32> to vector<16x128xf32>
    %82 = arith.addf %78, %81 : vector<16x128xf32>
    %cst_51 = arith.constant dense<0xFF800000> : vector<16xf32>
    %83 = vector.multi_reduction <maximumf>, %82, %cst_51 [1] : vector<16x128xf32> to vector<16xf32>
    %84 = vector.shape_cast %83 : vector<16xf32> to vector<16x1xf32>
    %85 = vector.broadcast %84 : vector<16x1xf32> to vector<16x128xf32>
    %86 = arith.subf %82, %85 : vector<16x128xf32>
    %87 = math.exp %86 : vector<16x128xf32>
    %cst_52 = arith.constant dense<0.000000e+00> : vector<16xf32>
    %88 = vector.multi_reduction <add>, %87, %cst_52 [1] : vector<16x128xf32> to vector<16xf32>
    %89 = vector.shape_cast %88 : vector<16xf32> to vector<16x1xf32>
    %90 = math.log %89 : vector<16x1xf32>
    %91 = vector.broadcast %90 : vector<16x1xf32> to vector<16x128xf32>
    %92 = arith.subf %86, %91 : vector<16x128xf32>
    %93 = arith.truncf %92 : vector<16x128xf32> to vector<16x128xbf16>
    %c0_53 = arith.constant 0 : index
    %c0_54 = arith.constant 0 : index
    %94 = vector.load %arg5[%c0_53, %c0_54] : memref<16x128xbf16, #tpu.memory_space<vmem>>, vector<16x128xbf16>
    tpu.vector_store %arg5[%c0_53, %c0_54], %93 {strides = array<i32>} : memref<16x128xbf16, #tpu.memory_space<vmem>>, vector<16x128xbf16>,
    return
  }
  func.func @transform_0(%arg0: i32) -> (i32, i32) {
    %c0_i32 = arith.constant 0 : i32
    %c0_i32_0 = arith.constant 0 : i32
    return %arg0, %c0_i32 : i32, i32
  }
  func.func @transform_1(%arg0: i32) -> (i32, i32) {
    %c0_i32 = arith.constant 0 : i32
    %c0_i32_0 = arith.constant 0 : i32
    %c0_i32_1 = arith.constant 0 : i32
    return %c0_i32, %c0_i32_0 : i32, i32
  }
  func.func @transform_2(%arg0: i32) -> (i32, i32, i32) {
    %c0_i32 = arith.constant 0 : i32
    %c0_i32_0 = arith.constant 0 : i32
    %c0_i32_1 = arith.constant 0 : i32
    %c0_i32_2 = arith.constant 0 : i32
    return %c0_i32, %c0_i32_0, %c0_i32_1 : i32, i32, i32
  }
  func.func @transform_3(%arg0: i32) -> (i32, i32, i32) {
    %c0_i32 = arith.constant 0 : i32
    %c0_i32_0 = arith.constant 0 : i32
    %c0_i32_1 = arith.constant 0 : i32
    %c0_i32_2 = arith.constant 0 : i32
    return %c0_i32, %c0_i32_0, %c0_i32_1 : i32, i32, i32
  }
  func.func @transform_4(%arg0: i32) -> (i32, i32) {
    %c0_i32 = arith.constant 0 : i32
    %c0_i32_0 = arith.constant 0 : i32
    return %arg0, %c0_i32 : i32, i32
  }
}

</mosaic_0001>

<bundles_post_ra>
// kernel: tpu_custom_call.1
= control target key start
LH: loop header
LB: loop body
LE: loop exit
PB: predicated region body
PF: predicated region fallthrough
CT: control target
= control target key end

     0   :  { %9 = vsyncpa [#allocation3], 0  ;;  %s1378_s0 = inlined_call_operand.hbm [shape: f32[16,64], index: 0, kind: input, shape index: {}]   ;;  %s1379_s1 = inlined_call_operand.hbm [shape: bf16[64,128], index: 1, kind: input, shape index: {}]   ;;  %s1380_s2 = inlined_call_operand.hbm [shape: bf16[5,128,128], index: 2, kind: input, shape index: {}]   ;;  %s1381_s3 = inlined_call_operand.vmem [shape: f32[6,1,128], index: 3, kind: input, shape index: {}]   ;;  %s1382_s4 = inlined_call_operand.hbm [shape: bf16[16,128], index: 4, kind: output, shape index: {}]  }
   0x1   :  { %10 = vsyncpa [#allocation6], 0 }
   0x2   :  { %11 = vsyncpa [#allocation4], 0  ;;  %s1212_s15 = smov [#allocation5]   ;;  %s1118_s19 = scalar_lea.hbm %s1379_s1, 512 }
   0x3   :  { %s29_s16 = sshll.u32 %s1212_s15, 4  ;;  %p1119_p0 = scmp.ne.s32.totalorder %s1379_s1, %s1118_s19  ;;  %s30_s16 = int_to_ptr.vmem [resolvable:$true] %s29_s16 }
   0x4   :  { %p1122_p1 = scmp.lt.u32.totalorder %s1118_s19, %s1379_s1 }
   0x6   :  { %p1124_p2 = pnand %p1122_p1, %p1119_p0 }
   0x8   :  { %1127 = shalt.err (!%p1124_p2)
}
   0x9   :  { %s1128_s24 = scalar_lea.vmem %s30_s16, 512  ;;  %p1133_p4 = scmp.lt.s32.totalorder %s30_s16, %s30_s16 }
   0xa   :  { %p1129_p3 = scmp.ne.s32.totalorder %s30_s16, %s1128_s24  ;;  %p1134_p5 = scmp.lt.s32.totalorder %s1128_s24, %s1128_s24 }
   0xc   :  { %p1135_p6 = por %p1134_p5, %p1133_p4 }
   0xe   :  { %p1136_p7 = pnand %p1135_p6, %p1129_p3 }
  0x10   :  { %1139 = shalt.err (!%p1136_p7)
}
  0x11   :  { %s1213_s25 = smov 64   ;;  %s1214_s26 = smov 4  }
  0x12   :  { %35 = dma.hbm_to_vmem [thread:$0]  %s1379_s1, 512, %s30_s16, [#allocation6], %s1213_s25, %s1213_s25, %s1214_s26  }
  0x13   :  { %s1215_s29 = smov [#allocation2]   ;;  %s1140_s7 = scalar_lea.hbm %s1378_s0, 256 }
  0x14   :  { %s17_s30 = sshll.u32 %s1215_s29, 4  ;;  %p1141_p8 = scmp.ne.s32.totalorder %s1378_s0, %s1140_s7  ;;  %s18_s30 = int_to_ptr.vmem [resolvable:$true] %s17_s30 }
  0x15   :  { %p1144_p9 = scmp.lt.u32.totalorder %s1140_s7, %s1378_s0 }
  0x17   :  { %p1146_p10 = pnand %p1144_p9, %p1141_p8 }
  0x19   :  { %1149 = shalt.err (!%p1146_p10)
}
  0x1a   :  { %s1150_s12 = scalar_lea.vmem %s18_s30, 256  ;;  %p1155_p12 = scmp.lt.s32.totalorder %s18_s30, %s18_s30 }
  0x1b   :  { %p1151_p11 = scmp.ne.s32.totalorder %s18_s30, %s1150_s12  ;;  %p1156_p13 = scmp.lt.s32.totalorder %s1150_s12, %s1150_s12 }
  0x1d   :  { %p1157_p0 = por %p1156_p13, %p1155_p12 }
  0x1f   :  { %p1158_p1 = pnand %p1157_p0, %p1151_p11 }
  0x21   :  { %1161 = shalt.err (!%p1158_p1)
}
  0x22   :  { %s1216_s1 = smov 128   ;;  %s1217_s13 = smov 8  }
  0x23   :  { %23 = dma.hbm_to_vmem [thread:$0]  %s1378_s0, 256, %s18_s30, [#allocation3], %s1216_s1, %s1216_s1, %s1217_s13  }
  0x24   :  { %s1218_s16 = smov [#allocation7]   ;;  %s1162_s20 = scalar_lea.hbm %s1380_s2, 5120 }
  0x25   :  { %s41_s17 = sshll.u32 %s1218_s16, 4  ;;  %p1163_p2 = scmp.ne.s32.totalorder %s1380_s2, %s1162_s20  ;;  %s42_s17 = int_to_ptr.vmem [resolvable:$true] %s41_s17 }
  0x26   :  { %p1166_p3 = scmp.lt.u32.totalorder %s1162_s20, %s1380_s2 }
  0x28   :  { %p1168_p4 = pnand %p1166_p3, %p1163_p2 }
  0x2a   :  { %1171 = shalt.err (!%p1168_p4)
}
  0x2b   :  { %s1172_s27 = scalar_lea.vmem %s42_s17, 5120  ;;  %p1177_p6 = scmp.lt.s32.totalorder %s42_s17, %s42_s17 }
  0x2c   :  { %p1173_p5 = scmp.ne.s32.totalorder %s42_s17, %s1172_s27  ;;  %p1178_p7 = scmp.lt.s32.totalorder %s1172_s27, %s1172_s27 }
  0x2e   :  { %p1179_p8 = por %p1178_p7, %p1177_p6 }
  0x30   :  { %p1180_p9 = pnand %p1179_p8, %p1173_p5 }
  0x32   :  { %1183 = shalt.err (!%p1180_p9)
}
  0x33   :  { %47 = dma.hbm_to_vmem [thread:$0]  %s1380_s2, 5120, %s42_s17, [#allocation6], %s1213_s25, %s1213_s25, %s1214_s26  }
  0x34   :  { %1206 = dma.done.wait [#allocation3], 256  }
  0x35   :  { %1207 = vsyncadd [#allocation3], 4294967040 }
  0x36   :  { %1208 = dma.done.wait [#allocation6], 5632  }
  0x37   :  { %1209 = vsyncadd [#allocation6], 4294961664  ;;  %v1219_v0 = vmov 0.0   ;;  %vm1220_vm0 = vmmov 0   ;;  %v1046_v1 = vld [vmem:[#allocation5] sm:$0xff]   ;;  %v1047_v2 = vld [vmem:[#allocation5 + $0x8] sm:$0xff]  }
  0x38   :  { %924 = vmatprep.subr.bf16.mxu0 %v1219_v0  ;;  %932 = vmatprep.mubr.msk.bf16.mxu0 %vm1220_vm0, %v1219_v0  ;;  %v1050_v3 = vld [vmem:[#allocation7] sm:$0xff]   ;;  %v1048_v4 = vld [vmem:[#allocation5 + $0x10] sm:$0xff]   ;;  %vm102_vm1 = vcmask 523264   ;;  %v1051_v5 = vld [vmem:[#allocation7 + $0x8] sm:$0xff]  }
  0x39   :  { %936 = vmatprep.subr.bf16.mxu1 %v1219_v0  ;;  %952 = vmatprep.mubr.msk.bf16.mxu1 %vm1220_vm0, %v1219_v0  ;;  %v1049_v6 = vld [vmem:[#allocation5 + $0x18] sm:$0xff]   ;;  %v60_v7 = vld [vmem:[#allocation2] sm:$0xff]  ;;  %v1054_v12 = vld [vmem:[#allocation7 + $0x20] sm:$0xff]  }
  0x3a   :  { %925 = vmatpush3.bf16.msra.mxu0 %v1046_v1  ;;  %937 = vmatpush3.bf16.msra.mxu1 %v1050_v3  ;;  %v61_v8 = vld [vmem:[#allocation2 + $0x8] sm:$0xff]  ;;  %v1052_v10 = vld [vmem:[#allocation7 + $0x10] sm:$0xff]   ;;  %v1055_v13 = vld [vmem:[#allocation7 + $0x28] sm:$0xff]  }
  0x3b   :  { %926 = vmatprep.subr.bf16.mxu0 %v1219_v0  ;;  %938 = vmatprep.subr.bf16.mxu1 %v1219_v0  ;;  %v62_v9 = vpack.c.bf16 %v61_v8, %v60_v7  ;;  %v1053_v11 = vld [vmem:[#allocation7 + $0x18] sm:$0xff]   ;;  %v1056_v14 = vld [vmem:[#allocation7 + $0x30] sm:$0xff]   ;;  %v1058_v16 = vld [vmem:[#allocation7 + $0x40] sm:$0xff]  }
  0x3c   :  { %v1057_v15 = vld [vmem:[#allocation7 + $0x38] sm:$0xff]   ;;  %v1059_v17 = vld [vmem:[#allocation7 + $0x48] sm:$0xff]   ;;  %v809_v18 = vld [vmem:[%s1381_s3] ss:$0 sm:$0xff] }
  0x3d   :  { %v1060_v34 = vld [vmem:[#allocation7 + $0x50] sm:$0xff]   ;;  %v1061_v35 = vld [vmem:[#allocation7 + $0x58] sm:$0xff]   ;;  %v1062_v36 = vld [vmem:[#allocation7 + $0x60] sm:$0xff]  }
  0x3e   :  { %927 = vmatpush3.bf16.msra.mxu0 %v1047_v2  ;;  %939 = vmatpush3.bf16.msra.mxu1 %v1051_v5  ;;  %v1063_v37 = vld [vmem:[#allocation7 + $0x68] sm:$0xff]   ;;  %v1064_v38 = vld [vmem:[#allocation7 + $0x70] sm:$0xff]   ;;  %v1065_v39 = vld [vmem:[#allocation7 + $0x78] sm:$0xff]  }
  0x3f   :  { %928 = vmatprep.subr.bf16.mxu0 %v1219_v0  ;;  %940 = vmatprep.subr.bf16.mxu1 %v1219_v0  ;;  %v1066_v40 = vld [vmem:[#allocation7 + $0x80] sm:$0xff]   ;;  %v1067_v41 = vld [vmem:[#allocation7 + $0x88] sm:$0xff]   ;;  %v816_v42 = vld [vmem:[%s1381_s3 + $0x1] ss:$0 sm:$0xff] }
  0x40   :  { %v1068_v58 = vld [vmem:[#allocation7 + $0x90] sm:$0xff]   ;;  %v1069_v59 = vld [vmem:[#allocation7 + $0x98] sm:$0xff]   ;;  %v1070_v60 = vld [vmem:[#allocation7 + $0xa0] sm:$0xff]  }
  0x41   :  { %v1071_v61 = vld [vmem:[#allocation7 + $0xa8] sm:$0xff]   ;;  %v1072_v62 = vld [vmem:[#allocation7 + $0xb0] sm:$0xff]   ;;  %v1073_v63 = vld [vmem:[#allocation7 + $0xb8] sm:$0xff]  }
  0x42   :  { %929 = vmatpush3.bf16.msra.mxu0 %v1048_v4  ;;  %941 = vmatpush3.bf16.msra.mxu1 %v1052_v10  ;;  %v1074_v1 = vld [vmem:[#allocation7 + $0xc0] sm:$0xff]   ;;  %v1075_v2 = vld [vmem:[#allocation7 + $0xc8] sm:$0xff]   ;;  %v826_v3 = vld [vmem:[%s1381_s3 + $0x2] ss:$0 sm:$0xff] }
  0x43   :  { %930 = vmatprep.subr.bf16.mxu0 %v1219_v0  ;;  %942 = vmatprep.subr.bf16.mxu1 %v1219_v0 }
  0x46   :  { %931 = vmatpush3.bf16.msra.mxu0 %v1049_v6  ;;  %943 = vmatpush3.bf16.msra.mxu1 %v1053_v11 }
  0x47   :  { %956 = vmatprep.subr.bf16.mxu0 %v1219_v0  ;;  %944 = vmatprep.subr.bf16.mxu1 %v1219_v0 }
  0x49   :  { %933 = vmatmul.mubr.msk.bf16.vlgmr.msra.gmra.mrb[0].mxu0 %vm102_vm1, %v62_v9 }
  0x4a   :  { %972 = vmatprep.mubr.msk.bf16.mxu0 %vm1220_vm0, %v1219_v0  ;;  %945 = vmatpush3.bf16.msra.mxu1 %v1054_v12 }
  0x4b   :  { %946 = vmatprep.subr.bf16.mxu1 %v1219_v0  ;;  %957 = vmatpush3.bf16.msra.mxu0 %v1058_v16 }
  0x4c   :  { %958 = vmatprep.subr.bf16.mxu0 %v1219_v0 }
  0x4e   :  { %947 = vmatpush3.bf16.msra.mxu1 %v1055_v13 }
  0x4f   :  { %948 = vmatprep.subr.bf16.mxu1 %v1219_v0  ;;  %959 = vmatpush3.bf16.msra.mxu0 %v1059_v17 }
  0x50   :  { %960 = vmatprep.subr.bf16.mxu0 %v1219_v0 }
  0x52   :  { %949 = vmatpush3.bf16.msra.mxu1 %v1056_v14 }
  0x53   :  { %950 = vmatprep.subr.bf16.mxu1 %v1219_v0  ;;  %961 = vmatpush3.bf16.msra.mxu0 %v1060_v34 }
  0x54   :  { %962 = vmatprep.subr.bf16.mxu0 %v1219_v0 }
  0x56   :  { %951 = vmatpush3.bf16.msra.mxu1 %v1057_v15 }
  0x57   :  { %976 = vmatprep.subr.bf16.mxu1 %v1219_v0  ;;  %963 = vmatpush3.bf16.msra.mxu0 %v1061_v35 }
  0x58   :  { %964 = vmatprep.subr.bf16.mxu0 %v1219_v0 }
  0x5b   :  { %965 = vmatpush3.bf16.msra.mxu0 %v1062_v36 }
  0x5c   :  { %966 = vmatprep.subr.bf16.mxu0 %v1219_v0 }
  0x5f   :  { %967 = vmatpush3.bf16.msra.mxu0 %v1063_v37 }
  0x60   :  { %968 = vmatprep.subr.bf16.mxu0 %v1219_v0 }
  0x63   :  { %969 = vmatpush3.bf16.msra.mxu0 %v1064_v38 }
  0x64   :  { %970 = vmatprep.subr.bf16.mxu0 %v1219_v0 }
  0x67   :  { %971 = vmatpush3.bf16.msra.mxu0 %v1065_v39 }
  0x68   :  { %996 = vmatprep.subr.bf16.mxu0 %v1219_v0 }
 0x11c   :  { %v140_v19 = vpop.f32.mrb[0].mxu0 }
 0x11d   :  { %v141_v20 = vadd.f32 %v809_v18, %v140_v19  ;;  %v934_v21 = vpop.f32.mrb[1].mxu0  ;;  %v1076_v19 = vld [vmem:[#allocation7 + $0xd0] sm:$0xff]  }
 0x11e   :  { %v143_v22 = vpop.f32.mrb[2].mxu0  ;;  %v1078_v21 = vld [vmem:[#allocation7 + $0xe0] sm:$0xff]  }
 0x11f   :  { %v147_v23 = vmul.f32 0.5, %v141_v20  ;;  %v144_v24 = vadd.f32 %v809_v18, %v143_v22  ;;  %v935_v25 = vpop.f32.mrb[3].mxu0  ;;  %v1077_v20 = vld [vmem:[#allocation7 + $0xd8] sm:$0xff]   ;;  %v1079_v22 = vld [vmem:[#allocation7 + $0xe8] sm:$0xff]  }
 0x120   :  { %v1082_v25 = vld [vmem:[#allocation7 + $0x100] sm:$0xff]  }
 0x121   :  { %1090 = vtanh.f32 %v147_v23  ;;  %v148_v26 = vmul.f32 0.5, %v144_v24  ;;  %v1080_v23 = vld [vmem:[#allocation7 + $0xf0] sm:$0xff]   ;;  %v1081_v24 = vld [vmem:[#allocation7 + $0xf8] sm:$0xff]  }
 0x123   :  { %1092 = vtanh.f32 %v148_v26  ;;  %v1083_v26 = vld [vmem:[#allocation7 + $0x108] sm:$0xff]  }
 0x12b   :  { %v1091_v27 = vpop.eup %1090 }
 0x12c   :  { %v151_v28 = vmul.f32 0.5, %v1091_v27  ;;  %v836_v27 = vld [vmem:[%s1381_s3 + $0x3] ss:$0 sm:$0xff] }
 0x12d   :  { %v1093_v29 = vpop.eup %1092 }
 0x12e   :  { %v152_v30 = vmul.f32 0.5, %v1093_v29  ;;  %v153_v31 = vadd.f32 0.5, %v151_v28 }
 0x130   :  { %v154_v32 = vadd.f32 0.5, %v152_v30 }
 0x132   :  { %v155_v33 = vpack.c.bf16 %v154_v32, %v153_v31 }
 0x134   :  { %953 = vmatmul.mubr.bf16.vlgmr.msra.gmra.mrb[0].mxu1 %v155_v33 }
 0x135   :  { %992 = vmatprep.mubr.msk.bf16.mxu1 %vm1220_vm0, %v1219_v0  ;;  %977 = vmatpush3.bf16.msra.mxu1 %v1066_v40 }
 0x136   :  { %978 = vmatprep.subr.bf16.mxu1 %v1219_v0 }
 0x139   :  { %979 = vmatpush3.bf16.msra.mxu1 %v1067_v41 }
 0x13a   :  { %980 = vmatprep.subr.bf16.mxu1 %v1219_v0 }
 0x13d   :  { %981 = vmatpush3.bf16.msra.mxu1 %v1068_v58 }
 0x13e   :  { %982 = vmatprep.subr.bf16.mxu1 %v1219_v0 }
 0x141   :  { %983 = vmatpush3.bf16.msra.mxu1 %v1069_v59 }
 0x142   :  { %984 = vmatprep.subr.bf16.mxu1 %v1219_v0 }
 0x145   :  { %985 = vmatpush3.bf16.msra.mxu1 %v1070_v60 }
 0x146   :  { %986 = vmatprep.subr.bf16.mxu1 %v1219_v0 }
 0x149   :  { %987 = vmatpush3.bf16.msra.mxu1 %v1071_v61 }
 0x14a   :  { %988 = vmatprep.subr.bf16.mxu1 %v1219_v0 }
 0x14d   :  { %989 = vmatpush3.bf16.msra.mxu1 %v1072_v62 }
 0x14e   :  { %990 = vmatprep.subr.bf16.mxu1 %v1219_v0 }
 0x151   :  { %991 = vmatpush3.bf16.msra.mxu1 %v1073_v63 }
 0x152   :  { %1016 = vmatprep.subr.bf16.mxu1 %v1219_v0 }
 0x207   :  { %v262_v43 = vpop.f32.mrb[0].mxu1 }
 0x208   :  { %v263_v44 = vadd.f32 %v816_v42, %v262_v43  ;;  %v954_v45 = vpop.f32.mrb[1].mxu1  ;;  %v1084_v43 = vld [vmem:[#allocation7 + $0x110] sm:$0xff]  }
 0x209   :  { %v265_v46 = vpop.f32.mrb[2].mxu1  ;;  %v1086_v45 = vld [vmem:[#allocation7 + $0x120] sm:$0xff]  }
 0x20a   :  { %v269_v47 = vmul.f32 0.5, %v263_v44  ;;  %v266_v48 = vadd.f32 %v816_v42, %v265_v46  ;;  %v955_v49 = vpop.f32.mrb[3].mxu1  ;;  %v1085_v44 = vld [vmem:[#allocation7 + $0x118] sm:$0xff]   ;;  %v1087_v46 = vld [vmem:[#allocation7 + $0x128] sm:$0xff]  }
 0x20b   :  { %v846_v49 = vld [vmem:[%s1381_s3 + $0x4] ss:$0 sm:$0xff] }
 0x20c   :  { %1094 = vtanh.f32 %v269_v47  ;;  %v270_v50 = vmul.f32 0.5, %v266_v48  ;;  %v1088_v47 = vld [vmem:[#allocation7 + $0x130] sm:$0xff]   ;;  %v1089_v48 = vld [vmem:[#allocation7 + $0x138] sm:$0xff]  }
 0x20e   :  { %1096 = vtanh.f32 %v270_v50 }
 0x216   :  { %v1095_v51 = vpop.eup %1094 }
 0x217   :  { %v273_v52 = vmul.f32 0.5, %v1095_v51 }
 0x218   :  { %v1097_v53 = vpop.eup %1096 }
 0x219   :  { %v274_v54 = vmul.f32 0.5, %v1097_v53  ;;  %v275_v55 = vadd.f32 0.5, %v273_v52 }
 0x21b   :  { %v276_v56 = vadd.f32 0.5, %v274_v54 }
 0x21d   :  { %v277_v57 = vpack.c.bf16 %v276_v56, %v275_v55 }
 0x21f   :  { %973 = vmatmul.mubr.bf16.vlgmr.msra.gmra.mrb[4].mxu0 %v277_v57 }
 0x220   :  { %1012 = vmatprep.mubr.msk.bf16.mxu0 %vm1220_vm0, %v1219_v0  ;;  %997 = vmatpush3.bf16.msra.mxu0 %v1074_v1  ;;  %v856_v1 = vld [vmem:[%s1381_s3 + $0x5] ss:$0 sm:$0xff]  ;;  %s1221_s3 = smov [#allocation8]  }
 0x221   :  { %998 = vmatprep.subr.bf16.mxu0 %v1219_v0  ;;  %s796_s13 = sshll.u32 %s1221_s3, 4  ;;  %s797_s13 = int_to_ptr.vmem [resolvable:$true] %s796_s13 }
 0x222   :  { %s1184_s14 = scalar_lea.vmem %s797_s13, 128  ;;  %p1189_p11 = scmp.lt.s32.totalorder %s797_s13, %s797_s13 }
 0x223   :  { %p1185_p10 = scmp.ne.s32.totalorder %s797_s13, %s1184_s14  ;;  %p1190_p12 = scmp.lt.s32.totalorder %s1184_s14, %s1184_s14 }
 0x224   :  { %999 = vmatpush3.bf16.msra.mxu0 %v1075_v2 }
 0x225   :  { %1000 = vmatprep.subr.bf16.mxu0 %v1219_v0  ;;  %p1191_p13 = por %p1190_p12, %p1189_p11 }
 0x227   :  { %p1192_p0 = pnand %p1191_p13, %p1185_p10 }
 0x228   :  { %1001 = vmatpush3.bf16.msra.mxu0 %v1076_v19 }
 0x229   :  { %1002 = vmatprep.subr.bf16.mxu0 %v1219_v0 }
 0x22c   :  { %1003 = vmatpush3.bf16.msra.mxu0 %v1077_v20 }
 0x22d   :  { %1004 = vmatprep.subr.bf16.mxu0 %v1219_v0 }
 0x230   :  { %1005 = vmatpush3.bf16.msra.mxu0 %v1078_v21 }
 0x231   :  { %1006 = vmatprep.subr.bf16.mxu0 %v1219_v0 }
 0x234   :  { %1007 = vmatpush3.bf16.msra.mxu0 %v1079_v22 }
 0x235   :  { %1008 = vmatprep.subr.bf16.mxu0 %v1219_v0 }
 0x238   :  { %1009 = vmatpush3.bf16.msra.mxu0 %v1080_v23 }
 0x239   :  { %1010 = vmatprep.subr.bf16.mxu0 %v1219_v0 }
 0x23c   :  { %1011 = vmatpush3.bf16.msra.mxu0 %v1081_v24 }
 0x2f2   :  { %v385_v4 = vpop.f32.mrb[4].mxu0 }
 0x2f3   :  { %v386_v5 = vadd.f32 %v826_v3, %v385_v4  ;;  %v974_v6 = vpop.f32.mrb[5].mxu0 }
 0x2f4   :  { %v388_v7 = vpop.f32.mrb[6].mxu0 }
 0x2f5   :  { %v392_v8 = vmul.f32 0.5, %v386_v5  ;;  %v389_v9 = vadd.f32 %v826_v3, %v388_v7  ;;  %v975_v10 = vpop.f32.mrb[7].mxu0 }
 0x2f7   :  { %1098 = vtanh.f32 %v392_v8  ;;  %v393_v11 = vmul.f32 0.5, %v389_v9 }
 0x2f9   :  { %1100 = vtanh.f32 %v393_v11 }
 0x301   :  { %v1099_v12 = vpop.eup %1098 }
 0x302   :  { %v396_v13 = vmul.f32 0.5, %v1099_v12 }
 0x303   :  { %v1101_v14 = vpop.eup %1100 }
 0x304   :  { %v397_v15 = vmul.f32 0.5, %v1101_v14  ;;  %v398_v16 = vadd.f32 0.5, %v396_v13 }
 0x306   :  { %v399_v17 = vadd.f32 0.5, %v397_v15 }
 0x308   :  { %v400_v18 = vpack.c.bf16 %v399_v17, %v398_v16 }
 0x30a   :  { %993 = vmatmul.mubr.bf16.vlgmr.msra.gmra.mrb[4].mxu1 %v400_v18 }
 0x30b   :  { %1032 = vmatprep.mubr.msk.bf16.mxu1 %vm1220_vm0, %v1219_v0  ;;  %1017 = vmatpush3.bf16.msra.mxu1 %v1082_v25 }
 0x30c   :  { %1018 = vmatprep.subr.bf16.mxu1 %v1219_v0 }
 0x30f   :  { %1019 = vmatpush3.bf16.msra.mxu1 %v1083_v26 }
 0x310   :  { %1020 = vmatprep.subr.bf16.mxu1 %v1219_v0 }
 0x313   :  { %1021 = vmatpush3.bf16.msra.mxu1 %v1084_v43 }
 0x314   :  { %1022 = vmatprep.subr.bf16.mxu1 %v1219_v0 }
 0x317   :  { %1023 = vmatpush3.bf16.msra.mxu1 %v1085_v44 }
 0x318   :  { %1024 = vmatprep.subr.bf16.mxu1 %v1219_v0 }
 0x31b   :  { %1025 = vmatpush3.bf16.msra.mxu1 %v1086_v45 }
 0x31c   :  { %1026 = vmatprep.subr.bf16.mxu1 %v1219_v0 }
 0x31f   :  { %1027 = vmatpush3.bf16.msra.mxu1 %v1087_v46 }
 0x320   :  { %1028 = vmatprep.subr.bf16.mxu1 %v1219_v0 }
 0x323   :  { %1029 = vmatpush3.bf16.msra.mxu1 %v1088_v47 }
 0x324   :  { %1030 = vmatprep.subr.bf16.mxu1 %v1219_v0 }
 0x327   :  { %1031 = vmatpush3.bf16.msra.mxu1 %v1089_v48 }
 0x3dd   :  { %v508_v28 = vpop.f32.mrb[4].mxu1 }
 0x3de   :  { %v509_v29 = vadd.f32 %v836_v27, %v508_v28  ;;  %v994_v30 = vpop.f32.mrb[5].mxu1 }
 0x3df   :  { %v511_v31 = vpop.f32.mrb[6].mxu1 }
 0x3e0   :  { %v515_v32 = vmul.f32 0.5, %v509_v29  ;;  %v512_v33 = vadd.f32 %v836_v27, %v511_v31  ;;  %v995_v34 = vpop.f32.mrb[7].mxu1 }
 0x3e2   :  { %1102 = vtanh.f32 %v515_v32  ;;  %v516_v35 = vmul.f32 0.5, %v512_v33 }
 0x3e4   :  { %1104 = vtanh.f32 %v516_v35 }
 0x3ec   :  { %v1103_v36 = vpop.eup %1102 }
 0x3ed   :  { %v519_v37 = vmul.f32 0.5, %v1103_v36 }
 0x3ee   :  { %v1105_v38 = vpop.eup %1104 }
 0x3ef   :  { %v520_v39 = vmul.f32 0.5, %v1105_v38  ;;  %v521_v40 = vadd.f32 0.5, %v519_v37 }
 0x3f1   :  { %v522_v41 = vadd.f32 0.5, %v520_v39 }
 0x3f3   :  { %v523_v42 = vpack.c.bf16 %v522_v41, %v521_v40 }
 0x3f5   :  { %1013 = vmatmul.mubr.bf16.vlgmr.msra.gmra.mrb[8].mxu0 %v523_v42 }
 0x4c8   :  { %v631_v50 = vpop.f32.mrb[8].mxu0 }
 0x4c9   :  { %v632_v51 = vadd.f32 %v846_v49, %v631_v50  ;;  %v1014_v52 = vpop.f32.mrb[9].mxu0 }
 0x4ca   :  { %v634_v53 = vpop.f32.mrb[10].mxu0 }
 0x4cb   :  { %v638_v54 = vmul.f32 0.5, %v632_v51  ;;  %v635_v55 = vadd.f32 %v846_v49, %v634_v53  ;;  %v1015_v56 = vpop.f32.mrb[11].mxu0 }
 0x4cd   :  { %1106 = vtanh.f32 %v638_v54  ;;  %v639_v57 = vmul.f32 0.5, %v635_v55 }
 0x4cf   :  { %1108 = vtanh.f32 %v639_v57 }
 0x4d7   :  { %v1107_v58 = vpop.eup %1106 }
 0x4d8   :  { %v642_v59 = vmul.f32 0.5, %v1107_v58 }
 0x4d9   :  { %v1109_v60 = vpop.eup %1108 }
 0x4da   :  { %v643_v0 = vmul.f32 0.5, %v1109_v60  ;;  %v644_v61 = vadd.f32 0.5, %v642_v59 }
 0x4dc   :  { %v645_v62 = vadd.f32 0.5, %v643_v0 }
 0x4de   :  { %v646_v63 = vpack.c.bf16 %v645_v62, %v644_v61 }
 0x4e0   :  { %1033 = vmatmul.mubr.bf16.vlgmr.msra.gmra.mrb[8].mxu1 %v646_v63 }
 0x5b3   :  { %v754_v2 = vpop.f32.mrb[8].mxu1 }
 0x5b4   :  { %v755_v3 = vadd.f32 %v856_v1, %v754_v2  ;;  %v1034_v4 = vpop.f32.mrb[9].mxu1 }
 0x5b5   :  { %v757_v5 = vpop.f32.mrb[10].mxu1 }
 0x5b6   :  { %761 = vmax.xlane.f32.xlu0 %v755_v3  ;;  %v1035_v6 = vpop.f32.mrb[11].mxu1  ;;  %v758_v7 = vadd.f32 %v856_v1, %v757_v5 }
 0x5ba   :  { %763 = vmax.xlane.f32.xlu0 %v758_v7 }
 0x643   :  { %v762_v8 = vpop.xlane.xlu0 %761 }
 0x644   :  { %v765_v9 = vsub.f32 %v755_v3, %v762_v8 }
 0x646   :  { %v767_v10 = vmul.f32 1.442695, %v765_v9 }
 0x647   :  { %v764_v11 = vpop.xlane.xlu0 %763 }
 0x648   :  { %v766_v12 = vsub.f32 %v758_v7, %v764_v11  ;;  %1110 = vpow2.f32 %v767_v10 }
 0x64a   :  { %v769_v13 = vmul.f32 1.442695, %v766_v12 }
 0x64c   :  { %1112 = vpow2.f32 %v769_v13 }
 0x652   :  { %v1111_v14 = vpop.eup %1110 }
 0x653   :  { %771 = vadd.xlane.f32.xlu1 %v1111_v14 }
 0x656   :  { %v1113_v15 = vpop.eup %1112 }
 0x657   :  { %773 = vadd.xlane.f32.xlu1 %v1113_v15 }
 0x6e0   :  { %v772_v16 = vpop.xlane.xlu1 %771 }
 0x6e1   :  { %1114 = vlog2.f32 %v772_v16 }
 0x6e4   :  { %v774_v17 = vpop.xlane.xlu1 %773 }
 0x6e5   :  { %1116 = vlog2.f32 %v774_v17 }
 0x6eb   :  { %v1115_v18 = vpop.eup %1114 }
 0x6ec   :  { %v776_v19 = vmul.f32 0.6931472, %v1115_v18 }
 0x6ee   :  { %v779_v22 = vsub.f32 %v765_v9, %v776_v19 }
 0x6ef   :  { %v1117_v20 = vpop.eup %1116 }
 0x6f0   :  { %v778_v21 = vmul.f32 0.6931472, %v1117_v20 }
 0x6f2   :  { %v780_v23 = vsub.f32 %v766_v12, %v778_v21 }
 0x6f4   :  { %v872_v24 = vpack.c.bf16 %v780_v23, %v779_v22 }
 0x6f6   :  { %873 = vst [vmem:[#allocation8] sm:$0xff] %v872_v24  }
 0x6f7   :  { %1195 = shalt.err (!%p1192_p0)
}
 0x6f8   :  { %s1196_s17 = scalar_lea.hbm %s1382_s4, 128 }
 0x6f9   :  { %p1197_p1 = scmp.ne.s32.totalorder %s1382_s4, %s1196_s17  ;;  %p1200_p2 = scmp.lt.u32.totalorder %s1196_s17, %s1382_s4 }
 0x6fb   :  { %p1202_p3 = pnand %p1200_p2, %p1197_p1 }
 0x6fd   :  { %1205 = shalt.err (!%p1202_p3)
}
 0x6fe   :  { %802 = dma.vmem_to_hbm [thread:$0]  %s797_s13, 128, %s1382_s4, [#allocation4], %s1213_s25, %s1213_s25, %s1214_s26  }
 0x6ff   :  { %1210 = dma.done.wait [#allocation4], 128  }
 0x700   :  { %1211 = vsyncadd [#allocation4], 4294967168 }
 0x701   :  { %806 = vsyncpa [#allocation3], 1 }
 0x702   :  { %807 = vsyncpa [#allocation6], 1 }
 0x703   :  { %808 = vsyncpa [#allocation4], 1 }

</bundles_post_ra>
